<compile_context>
chip_gen: v6e
topology: v6e:2x2x1
jax: 0.10.0
libtpu: 0.0.40
codegen_flags: <defaults>
</compile_context>

<pallas_src>
import jax
import jax.numpy as jnp
from jax import lax
from jax.experimental import pallas as pl
from jax.experimental.pallas import tpu as pltpu


def closed_loop_rollout_kernel(x_ref, w1s_ref, b1s_ref, wcf_ref, wf2_ref,
                               bf2_ref, traj_ref):
    """One batch tile, full T-step closed-loop rollout (batch on lanes)."""
    n_steps = traj_ref.shape[0]
    hidden = wcf_ref.shape[0]

    # Full-extent, constant-index blocks: DMA'd once, VMEM-resident for the
    # whole grid / rollout.
    w1s = w1s_ref[...]          # (2H, x_dim)  stacked [Wc1^T ; Wf1x^T]
    b1s = b1s_ref[...]          # (2H, 1)      stacked [bc1 ; bc2@Wf1u + bf1]^T
    wcf = wcf_ref[...]          # (H, H)       (Wc2 @ Wf1u)^T
    wf2 = wf2_ref[...]          # (x_dim, H)
    bf2 = bf2_ref[...]          # (x_dim, 1)

    def step_from_h(h):
        # h: (2H, TB) f32 stacked first-layer pre-activations.
        h_c = jnp.maximum(h[:hidden], 0.0)                    # controller hidden
        h_f = h[hidden:] + jnp.dot(wcf, h_c.astype(wcf.dtype),
                                   preferred_element_type=jnp.float32)
        h_f = jnp.maximum(h_f, 0.0)                           # dynamics hidden
        yT = jnp.dot(wf2, h_f.astype(wf2.dtype),
                     preferred_element_type=jnp.float32) + bf2
        return yT                                             # (x_dim, TB) f32

    # Step 0: x arrives in natural (TB, x_dim) layout; contract the feature
    # dims directly (same structure as q @ k^T) -> no wrapper transpose.
    h0 = lax.dot_general(w1s, x_ref[...].astype(w1s.dtype),
                         (((1,), (1,)), ((), ())),
                         preferred_element_type=jnp.float32) + b1s
    yT = step_from_h(h0)
    traj_ref[0] = yT.astype(traj_ref.dtype)

    # Steps 1..T-1: state stays in the transposed (x_dim, TB) layout on-chip,
    # only the per-step outputs are stored (lane-dense) to the trajectory.
    def body(t, y):
        h = jnp.dot(w1s, y.astype(w1s.dtype),
                    preferred_element_type=jnp.float32) + b1s
        y_new = step_from_h(h)
        traj_ref[t] = y_new.astype(traj_ref.dtype)
        return y_new

    lax.fori_loop(1, n_steps, body, yT)


def _round_up(n, m):
    return -(-n // m) * m


def _prepare_weights(params, cast_to_bf16):
    """Fold controller output layer + concat into dynamics layer 1 and stack
    the two x-contractions.  Done once, outside the kernel."""
    mm_dtype = jnp.bfloat16 if cast_to_bf16 else jnp.float32
    wcf = params["wc2"] @ params["wf1u"]                        # (H, H)
    bf1p = params["bc2"] @ params["wf1u"] + params["bf1"]       # (1, H)
    w1s = jnp.concatenate([params["wc1"].T, params["wf1x"].T], axis=0)  # (2H, x_dim)
    b1s = jnp.concatenate([params["bc1"], bf1p], axis=1).T              # (2H, 1)
    return (w1s.astype(mm_dtype),
            b1s.astype(jnp.float32),
            wcf.T.astype(mm_dtype),
            params["wf2"].T.astype(mm_dtype),
            params["bf2"].T.astype(jnp.float32))


def closed_loop_rollout(x, params, num_steps, *, tb=None, cast_to_bf16=False,
                        out_dtype=jnp.float32):
    """Fused T-step rollout.  Returns states y_1..y_T, shape (T, x_dim, B_pad)."""
    if num_steps < 1:
        raise ValueError("num_steps must be >= 1")
    B, x_dim = x.shape
    w1s, b1s, wcfT, wf2T, bf2T = _prepare_weights(params, cast_to_bf16)

    # Batch tile selection: as few and as large grid steps as possible.
    b128 = _round_up(B, 128)
    if tb is None:
        if b128 <= 1024:
            tb_eff = b128                               # single grid step
        else:
            # small even number of big tiles -> both v7x TensorCores get work
            tb_eff = min(4096, _round_up(-(-b128 // 2), 128))
    else:
        if tb % 128 != 0:
            raise ValueError("tb must be a multiple of 128")
        tb_eff = min(tb, b128)
    Bp = _round_up(B, tb_eff)

    x_in = x if Bp == B else jnp.pad(x, ((0, Bp - B), (0, 0)))

    def resident(a):  # full-extent, constant index -> stays in VMEM
        return pl.BlockSpec(a.shape, lambda i: (0, 0))

    trajT = pl.pallas_call(
        closed_loop_rollout_kernel,
        out_shape=jax.ShapeDtypeStruct((num_steps, x_dim, Bp), out_dtype),
        grid_spec=pl.GridSpec(
            grid=(Bp // tb_eff,),
            in_specs=[
                pl.BlockSpec((tb_eff, x_dim), lambda i: (i, 0)),   # x, natural layout
                resident(w1s), resident(b1s),
                resident(wcfT), resident(wf2T), resident(bf2T),
            ],
            out_specs=pl.BlockSpec((num_steps, x_dim, tb_eff), lambda i: (0, 0, i)),
        ),
        compiler_params=pltpu.CompilerParams(
            dimension_semantics=("parallel",),   # independent batch tiles
        ),
    )(x_in, w1s, b1s, wcfT, wf2T, bf2T)
    return trajT


def closed_loop_forward(x, params, *, tb=None, cast_to_bf16=False):
    """ClosedLoopDynamics.forward: (B, x_dim) -> (B, x_dim)."""
    B = x.shape[0]
    trajT = closed_loop_rollout(x, params, 1, tb=tb, cast_to_bf16=cast_to_bf16)
    return trajT[0, :, :B].T


def simulate_trajectory(x, params, step, *, tb=None, cast_to_bf16=False):
    """ClosedLoopDynamics.simulate_trajectory: (B, x_dim) -> (B, step+1, x_dim)."""
    B = x.shape[0]
    trajT = closed_loop_rollout(x, params, step, tb=tb, cast_to_bf16=cast_to_bf16)
    traj = jnp.transpose(trajT[:, :, :B], (2, 0, 1))   # one transpose per rollout
    return jnp.concatenate([x[:, None, :].astype(traj.dtype), traj], axis=1)


def init_params(key, x_dim, u_dim, hidden):
    """Deterministic synthetic parameters (no checkpoint load)."""
    ks = jax.random.split(key, 8)
    s = 0.1
    wf1 = s * jax.random.normal(ks[4], (x_dim + u_dim, hidden), jnp.float32)
    return {
        # controller MLP: x_dim -> hidden -> u_dim
        "wc1": s * jax.random.normal(ks[0], (x_dim, hidden), jnp.float32),
        "bc1": s * jax.random.normal(ks[1], (1, hidden), jnp.float32),
        "wc2": s * jax.random.normal(ks[2], (hidden, u_dim), jnp.float32),
        "bc2": s * jax.random.normal(ks[3], (1, u_dim), jnp.float32),
        # forward_dyn MLP: (x_dim + u_dim) -> hidden -> x_dim
        "wf1x": wf1[:x_dim],      # rows acting on x
        "wf1u": wf1[x_dim:],      # rows acting on u
        "bf1": s * jax.random.normal(ks[5], (1, hidden), jnp.float32),
        "wf2": s * jax.random.normal(ks[6], (hidden, x_dim), jnp.float32),
        "bf2": s * jax.random.normal(ks[7], (1, x_dim), jnp.float32),
    }


def reference_forward(x, p):
    """Pure-JAX reference of ClosedLoopDynamics.forward (concat version)."""
    h_c = jnp.maximum(x @ p["wc1"] + p["bc1"], 0.0)
    u = h_c @ p["wc2"] + p["bc2"]
    aug_x = jnp.concatenate([x, u], axis=-1)
    wf1 = jnp.concatenate([p["wf1x"], p["wf1u"]], axis=0)
    h_f = jnp.maximum(aug_x @ wf1 + p["bf1"], 0.0)
    return h_f @ p["wf2"] + p["bf2"]


def reference_trajectory(x, p, step):
    traj = [x]
    for _ in range(step):
        x = reference_forward(x, p)
        traj.append(x)
    return jnp.stack(traj, axis=1)


if __name__ == "__main__":
    B, X_DIM, U_DIM, HIDDEN, STEPS = 256, 8, 4, 32, 4

    key = jax.random.PRNGKey(0)
    k_x, k_p = jax.random.split(key)
    x = jax.random.normal(k_x, (B, X_DIM), jnp.float32)
    params = init_params(k_p, X_DIM, U_DIM, HIDDEN)

    # --- single-step forward (f32 path, single grid step) ---
    y_ref = reference_forward(x, params)
    y = jax.block_until_ready(closed_loop_forward(x, params))
    assert y.shape == (B, X_DIM)
    assert jnp.allclose(y, y_ref, atol=5e-4, rtol=1e-3), "f32 forward mismatch"

    # --- fused multi-step rollout (f32 path) ---
    traj_ref = reference_trajectory(x, params, STEPS)
    traj = jax.block_until_ready(simulate_trajectory(x, params, STEPS))
    assert traj.shape == (B, STEPS + 1, X_DIM)
    assert jnp.allclose(traj, traj_ref, atol=1e-3, rtol=1e-2), "rollout mismatch"

    # --- bf16-operand MXU path (v6e/v7x fast path); f32 accumulation ---
    y_bf16 = jax.block_until_ready(
        closed_loop_forward(x, params, cast_to_bf16=True))
    assert jnp.allclose(y_bf16, y_ref, atol=5e-2, rtol=5e-2), "bf16 mismatch"

    print("KERNEL_OK")
</pallas_src>

<mosaic_0001>
module attributes {stable_mosaic.version = 11 : i64} {
  func.func @closed_loop_rollout_kernel(%arg0: i32, %arg1: memref<256x8xf32, #tpu.memory_space<vmem>>, %arg2: memref<64x8xf32, #tpu.memory_space<vmem>>, %arg3: memref<64x1xf32, #tpu.memory_space<vmem>>, %arg4: memref<32x32xf32, #tpu.memory_space<vmem>>, %arg5: memref<8x32xf32, #tpu.memory_space<vmem>>, %arg6: memref<8x1xf32, #tpu.memory_space<vmem>>, %arg7: memref<1x8x256xf32, #tpu.memory_space<vmem>>) attributes {dimension_semantics = [#tpu.dimension_semantics<parallel>], iteration_bounds = array<i64: 1>, scalar_prefetch = 0 : i64, scratch_operands = 0 : i64, tpu.core_type = #tpu.core_type<tc>, window_params = [{transform_indices = @transform_0, window_bounds = array<i64: 256, 8>}, {pipeline_mode = #tpu.pipeline_mode<synchronous>, transform_indices = @transform_1, window_bounds = array<i64: 64, 8>}, {pipeline_mode = #tpu.pipeline_mode<synchronous>, transform_indices = @transform_2, window_bounds = array<i64: 64, 1>}, {pipeline_mode = #tpu.pipeline_mode<synchronous>, transform_indices = @transform_3, window_bounds = array<i64: 32, 32>}, {pipeline_mode = #tpu.pipeline_mode<synchronous>, transform_indices = @transform_4, window_bounds = array<i64: 8, 32>}, {pipeline_mode = #tpu.pipeline_mode<synchronous>, transform_indices = @transform_5, window_bounds = array<i64: 8, 1>}, {transform_indices = @transform_6, window_bounds = array<i64: 1, 8, 256>}]} {
    %c0 = arith.constant 0 : index
    %c0_0 = arith.constant 0 : index
    %0 = vector.load %arg2[%c0, %c0_0] : memref<64x8xf32, #tpu.memory_space<vmem>>, vector<64x8xf32>
    %c0_1 = arith.constant 0 : index
    %c0_2 = arith.constant 0 : index
    %1 = vector.load %arg3[%c0_1, %c0_2] : memref<64x1xf32, #tpu.memory_space<vmem>>, vector<64x1xf32>
    %c0_3 = arith.constant 0 : index
    %c0_4 = arith.constant 0 : index
    %2 = vector.load %arg4[%c0_3, %c0_4] : memref<32x32xf32, #tpu.memory_space<vmem>>, vector<32x32xf32>
    %c0_5 = arith.constant 0 : index
    %c0_6 = arith.constant 0 : index
    %3 = vector.load %arg5[%c0_5, %c0_6] : memref<8x32xf32, #tpu.memory_space<vmem>>, vector<8x32xf32>
    %c0_7 = arith.constant 0 : index
    %c0_8 = arith.constant 0 : index
    %4 = vector.load %arg6[%c0_7, %c0_8] : memref<8x1xf32, #tpu.memory_space<vmem>>, vector<8x1xf32>
    %c0_9 = arith.constant 0 : index
    %c0_10 = arith.constant 0 : index
    %5 = vector.load %arg1[%c0_9, %c0_10] : memref<256x8xf32, #tpu.memory_space<vmem>>, vector<256x8xf32>
    %cst = arith.constant dense<0.000000e+00> : vector<64x256xf32>
    %6 = tpu.matmul %0, %5, %cst {dimension_numbers = #tpu.dot_dimension_numbers<[1], [1], [0], [0], [0, 0, 1, 0], [], []>} : vector<64x8xf32>, vector<256x8xf32>, vector<64x256xf32> -> vector<64x256xf32>
    %7 = vector.broadcast %1 : vector<64x1xf32> to vector<64x256xf32>
    %8 = arith.addf %6, %7 : vector<64x256xf32>
    %9 = vector.extract_strided_slice %8 {offsets = [0, 0], sizes = [32, 256], strides = [1, 1]} : vector<64x256xf32> to vector<32x256xf32>
    %cst_11 = arith.constant 0.000000e+00 : f32
    %10 = vector.broadcast %cst_11 : f32 to vector<32x256xf32>
    %11 = arith.maximumf %9, %10 : vector<32x256xf32>
    %12 = vector.extract_strided_slice %8 {offsets = [32, 0], sizes = [32, 256], strides = [1, 1]} : vector<64x256xf32> to vector<32x256xf32>
    %cst_12 = arith.constant dense<0.000000e+00> : vector<32x256xf32>
    %13 = tpu.matmul %2, %11, %cst_12 {dimension_numbers = #tpu.dot_dimension_numbers<[1], [0], [0], [1], [0, 0, 1, 1], [], []>} : vector<32x32xf32>, vector<32x256xf32>, vector<32x256xf32> -> vector<32x256xf32>
    %14 = arith.addf %12, %13 : vector<32x256xf32>
    %cst_13 = arith.constant 0.000000e+00 : f32
    %15 = vector.broadcast %cst_13 : f32 to vector<32x256xf32>
    %16 = arith.maximumf %14, %15 : vector<32x256xf32>
    %cst_14 = arith.constant dense<0.000000e+00> : vector<8x256xf32>
    %17 = tpu.matmul %3, %16, %cst_14 {dimension_numbers = #tpu.dot_dimension_numbers<[1], [0], [0], [1], [0, 0, 1, 1], [], []>} : vector<8x32xf32>, vector<32x256xf32>, vector<8x256xf32> -> vector<8x256xf32>
    %18 = vector.broadcast %4 : vector<8x1xf32> to vector<8x256xf32>
    %19 = arith.addf %17, %18 : vector<8x256xf32>
    %c0_15 = arith.constant 0 : index
    %c0_16 = arith.constant 0 : index
    %c0_17 = arith.constant 0 : index
    %20 = vector.load %arg7[%c0_15, %c0_16, %c0_17] : memref<1x8x256xf32, #tpu.memory_space<vmem>>, vector<1x8x256xf32>
    %21 = vector.shape_cast %20 : vector<1x8x256xf32> to vector<8x256xf32>
    %22 = vector.shape_cast %19 : vector<8x256xf32> to vector<1x8x256xf32>
    tpu.vector_store %arg7[%c0_15, %c0_16, %c0_17], %22 {strides = array<i32>} : memref<1x8x256xf32, #tpu.memory_space<vmem>>, vector<1x8x256xf32>,
    %c1_i32 = arith.constant 1 : i32
    %c0_i32 = arith.constant 0 : i32
    %23 = arith.addi %c1_i32, %c0_i32 : i32
    %c1_i32_18 = arith.constant 1 : i32
    %24 = scf.for %arg8 = %c1_i32 to %23 step %c1_i32_18 iter_args(%arg9 = %19) -> (vector<8x256xf32>)  : i32 {
      %cst_20 = arith.constant dense<0.000000e+00> : vector<64x256xf32>
      %25 = tpu.matmul %0, %arg9, %cst_20 {dimension_numbers = #tpu.dot_dimension_numbers<[1], [0], [0], [1], [0, 0, 1, 1], [], []>} : vector<64x8xf32>, vector<8x256xf32>, vector<64x256xf32> -> vector<64x256xf32>
      %26 = vector.broadcast %1 : vector<64x1xf32> to vector<64x256xf32>
      %27 = arith.addf %25, %26 : vector<64x256xf32>
      %28 = vector.extract_strided_slice %27 {offsets = [0, 0], sizes = [32, 256], strides = [1, 1]} : vector<64x256xf32> to vector<32x256xf32>
      %cst_21 = arith.constant 0.000000e+00 : f32
      %29 = vector.broadcast %cst_21 : f32 to vector<32x256xf32>
      %30 = arith.maximumf %28, %29 : vector<32x256xf32>
      %31 = vector.extract_strided_slice %27 {offsets = [32, 0], sizes = [32, 256], strides = [1, 1]} : vector<64x256xf32> to vector<32x256xf32>
      %cst_22 = arith.constant dense<0.000000e+00> : vector<32x256xf32>
      %32 = tpu.matmul %2, %30, %cst_22 {dimension_numbers = #tpu.dot_dimension_numbers<[1], [0], [0], [1], [0, 0, 1, 1], [], []>} : vector<32x32xf32>, vector<32x256xf32>, vector<32x256xf32> -> vector<32x256xf32>
      %33 = arith.addf %31, %32 : vector<32x256xf32>
      %cst_23 = arith.constant 0.000000e+00 : f32
      %34 = vector.broadcast %cst_23 : f32 to vector<32x256xf32>
      %35 = arith.maximumf %33, %34 : vector<32x256xf32>
      %cst_24 = arith.constant dense<0.000000e+00> : vector<8x256xf32>
      %36 = tpu.matmul %3, %35, %cst_24 {dimension_numbers = #tpu.dot_dimension_numbers<[1], [0], [0], [1], [0, 0, 1, 1], [], []>} : vector<8x32xf32>, vector<32x256xf32>, vector<8x256xf32> -> vector<8x256xf32>
      %37 = vector.broadcast %4 : vector<8x1xf32> to vector<8x256xf32>
      %38 = arith.addf %36, %37 : vector<8x256xf32>
      %39 = arith.index_cast %arg8 : i32 to index
      %c0_25 = arith.constant 0 : index
      %c0_26 = arith.constant 0 : index
      %40 = vector.load %arg7[%39, %c0_25, %c0_26] : memref<1x8x256xf32, #tpu.memory_space<vmem>>, vector<1x8x256xf32>
      %41 = vector.shape_cast %40 : vector<1x8x256xf32> to vector<8x256xf32>
      %42 = vector.shape_cast %38 : vector<8x256xf32> to vector<1x8x256xf32>
      tpu.vector_store %arg7[%39, %c0_25, %c0_26], %42 {strides = array<i32>} : memref<1x8x256xf32, #tpu.memory_space<vmem>>, vector<1x8x256xf32>,
      scf.yield %38 : vector<8x256xf32>
    }
    %c0_i32_19 = arith.constant 0 : i32
    return
  }
  func.func @transform_0(%arg0: i32) -> (i32, i32) {
    %c0_i32 = arith.constant 0 : i32
    %c0_i32_0 = arith.constant 0 : i32
    return %arg0, %c0_i32 : i32, i32
  }
  func.func @transform_1(%arg0: i32) -> (i32, i32) {
    %c0_i32 = arith.constant 0 : i32
    %c0_i32_0 = arith.constant 0 : i32
    %c0_i32_1 = arith.constant 0 : i32
    return %c0_i32, %c0_i32_0 : i32, i32
  }
  func.func @transform_2(%arg0: i32) -> (i32, i32) {
    %c0_i32 = arith.constant 0 : i32
    %c0_i32_0 = arith.constant 0 : i32
    %c0_i32_1 = arith.constant 0 : i32
    return %c0_i32, %c0_i32_0 : i32, i32
  }
  func.func @transform_3(%arg0: i32) -> (i32, i32) {
    %c0_i32 = arith.constant 0 : i32
    %c0_i32_0 = arith.constant 0 : i32
    %c0_i32_1 = arith.constant 0 : i32
    return %c0_i32, %c0_i32_0 : i32, i32
  }
  func.func @transform_4(%arg0: i32) -> (i32, i32) {
    %c0_i32 = arith.constant 0 : i32
    %c0_i32_0 = arith.constant 0 : i32
    %c0_i32_1 = arith.constant 0 : i32
    return %c0_i32, %c0_i32_0 : i32, i32
  }
  func.func @transform_5(%arg0: i32) -> (i32, i32) {
    %c0_i32 = arith.constant 0 : i32
    %c0_i32_0 = arith.constant 0 : i32
    %c0_i32_1 = arith.constant 0 : i32
    return %c0_i32, %c0_i32_0 : i32, i32
  }
  func.func @transform_6(%arg0: i32) -> (i32, i32, i32) {
    %c0_i32 = arith.constant 0 : i32
    %c0_i32_0 = arith.constant 0 : i32
    %c0_i32_1 = arith.constant 0 : i32
    return %c0_i32, %c0_i32_0, %arg0 : i32, i32, i32
  }
}

</mosaic_0001>

<bundles_post_ra>
// kernel: tpu_custom_call.1
= control target key start
LH: loop header
LB: loop body
LE: loop exit
PB: predicated region body
PF: predicated region fallthrough
CT: control target
= control target key end

     0   :  { %vm118_vm0 = vcmask 64512   ;;  %v693_v3 = vmov 0   ;;  %s953_s0 = inlined_call_operand.vmem [shape: f32[256,8], index: 0, kind: input, shape index: {}]   ;;  %s954_s1 = inlined_call_operand.vmem [shape: f32[64,8], index: 1, kind: input, shape index: {}]   ;;  %s955_s2 = inlined_call_operand.vmem [shape: f32[64,1], index: 2, kind: input, shape index: {}]   ;;  %s956_s3 = inlined_call_operand.vmem [shape: f32[32,32], index: 3, kind: input, shape index: {}]   ;;  %s957_s4 = inlined_call_operand.vmem [shape: f32[8,32], index: 4, kind: input, shape index: {}]   ;;  %s958_s5 = inlined_call_operand.vmem [shape: f32[8,1], index: 5, kind: input, shape index: {}]   ;;  %s959_s6 = inlined_call_operand.hbm [shape: f32[1,8,256], index: 6, kind: output, shape index: {}]  }
   0x1   :  { %v77_v0 = vld [vmem:[%s953_s0 + $0xf8] sm:$0xff]  ;;  %v76_v2 = vld [vmem:[%s953_s0 + $0xf0] sm:$0xff]  ;;  %670 = vset.pattern.permute.xlu1 %v693_v3  ;;  %669 = vset.pattern.permute.xlu0 %v693_v3  ;;  %v75_v5 = vld [vmem:[%s953_s0 + $0xe8] sm:$0xff] }
   0x2   :  { %v61_v1 = vld [vmem:[%s953_s0 + $0x78] sm:$0xff]  ;;  %618 = vmatprep.subr.msk.mxu0 %vm118_vm0, %v77_v0  ;;  %v60_v4 = vld [vmem:[%s953_s0 + $0x70] sm:$0xff]  ;;  %v59_v6 = vld [vmem:[%s953_s0 + $0x68] sm:$0xff] }
   0x3   :  { %619 = vmatpush3.xpose.msk.msra.mxu0 %vm118_vm0, %v61_v1  ;;  %v74_v7 = vld [vmem:[%s953_s0 + $0xe0] sm:$0xff]  ;;  %v73_v10 = vld [vmem:[%s953_s0 + $0xd8] sm:$0xff]  ;;  %v33_v12 = vld [vmem:[%s955_s2 + $0x8] sm:$0xff] }
   0x4   :  { %620 = vmatprep.subr.msk.mxu0 %vm118_vm0, %v76_v2  ;;  %v761_v8 = vld [vmem:[%s954_s1] sm:$0xff]  ;;  %v35_v11 = vld [vmem:[%s955_s2 + $0x18] sm:$0xff]  ;;  %85 = vperm.xlu1 %670, %v33_v12   ;;  %v34_v14 = vld [vmem:[%s955_s2 + $0x10] sm:$0xff] }
   0x5   :  { %v58_v9 = vld [vmem:[%s953_s0 + $0x60] sm:$0xff]  ;;  %650 = vmatprep.mubr.msk.f32.mxu0 %vm118_vm0, %v761_v8  ;;  %95 = vperm.xlu0 %669, %v35_v11   ;;  %v57_v13 = vld [vmem:[%s953_s0 + $0x58] sm:$0xff]  ;;  %v72_v15 = vld [vmem:[%s953_s0 + $0xd0] sm:$0xff] }
   0x6   :  { %v32_v16 = vld [vmem:[%s955_s2] sm:$0xff] }
   0x7   :  { %621 = vmatpush3.xpose.msk.msra.mxu0 %vm118_vm0, %v60_v4 }
   0x8   :  { %622 = vmatprep.subr.msk.mxu0 %vm118_vm0, %v75_v5 }
   0xb   :  { %623 = vmatpush3.xpose.msk.msra.mxu0 %vm118_vm0, %v59_v6 }
   0xc   :  { %624 = vmatprep.subr.msk.mxu0 %vm118_vm0, %v74_v7 }
   0xf   :  { %625 = vmatpush3.xpose.msk.msra.mxu0 %vm118_vm0, %v58_v9 }
  0x10   :  { %626 = vmatprep.subr.msk.mxu0 %vm118_vm0, %v73_v10 }
  0x11   :  { %11 = vsyncpa [#allocation3], 0  ;;  %90 = vperm.xlu0 %669, %v34_v14   ;;  %v56_v17 = vld [vmem:[%s953_s0 + $0x50] sm:$0xff]  ;;  %80 = vperm.xlu1 %670, %v32_v16   ;;  %v39_v18 = vld [vmem:[%s955_s2 + $0x38] sm:$0xff]  ;;  %v694_v50 = vmov 0.0   ;;  %vm360_vm1 = vcmask 261120  }
  0x12   :  { %v71_v19 = vld [vmem:[%s953_s0 + $0xc8] sm:$0xff]  ;;  %v38_v20 = vld [vmem:[%s955_s2 + $0x30] sm:$0xff]  ;;  %v70_v23 = vld [vmem:[%s953_s0 + $0xc0] sm:$0xff]  ;;  %437 = vmatprep.mubr.f32.mxu1 %v694_v50  ;;  %s695_s26 = smov [#allocation2]  }
  0x13   :  { %627 = vmatpush3.xpose.msk.msra.mxu0 %vm118_vm0, %v57_v13  ;;  %v55_v21 = vld [vmem:[%s953_s0 + $0x48] sm:$0xff]  ;;  %v36_v24 = vld [vmem:[%s955_s2 + $0x20] sm:$0xff]  ;;  %v69_v27 = vld [vmem:[%s953_s0 + $0xb8] sm:$0xff] }
  0x14   :  { %628 = vmatprep.subr.msk.mxu0 %vm118_vm0, %v72_v15  ;;  %v37_v22 = vld [vmem:[%s955_s2 + $0x28] sm:$0xff]  ;;  %v54_v25 = vld [vmem:[%s953_s0 + $0x40] sm:$0xff]  ;;  %v53_v28 = vld [vmem:[%s953_s0 + $0x38] sm:$0xff]  ;;  %s565_s2 = sshll.u32 %s695_s26, 4  ;;  %s566_s2 = int_to_ptr.vmem [resolvable:$true] %s565_s2 }
  0x15   :  { %115 = vperm.xlu0 %669, %v39_v18   ;;  %110 = vperm.xlu1 %670, %v38_v20   ;;  %v45_v26 = vld [vmem:[%s958_s5] sm:$0xff]  ;;  %v68_v29 = vld [vmem:[%s953_s0 + $0xb0] sm:$0xff]  ;;  %v67_v31 = vld [vmem:[%s953_s0 + $0xa8] sm:$0xff]  ;;  %s671_s27 = scalar_lea.vmem %s566_s2, 256  ;;  %p676_p1 = scmp.lt.s32.totalorder %s566_s2, %s566_s2 }
  0x16   :  { %v52_v30 = vld [vmem:[%s953_s0 + $0x30] sm:$0xff]  ;;  %v51_v32 = vld [vmem:[%s953_s0 + $0x28] sm:$0xff]  ;;  %v66_v33 = vld [vmem:[%s953_s0 + $0xa0] sm:$0xff]  ;;  %p672_p0 = scmp.ne.s32.totalorder %s566_s2, %s671_s27  ;;  %p677_p2 = scmp.lt.s32.totalorder %s671_s27, %s671_s27 }
  0x17   :  { %629 = vmatpush3.xpose.msk.msra.mxu0 %vm118_vm0, %v56_v17  ;;  %v50_v34 = vld [vmem:[%s953_s0 + $0x20] sm:$0xff]  ;;  %v65_v35 = vld [vmem:[%s953_s0 + $0x98] sm:$0xff]  ;;  %v64_v37 = vld [vmem:[%s953_s0 + $0x90] sm:$0xff] }
  0x18   :  { %630 = vmatprep.subr.msk.mxu0 %vm118_vm0, %v71_v19  ;;  %v49_v36 = vld [vmem:[%s953_s0 + $0x18] sm:$0xff]  ;;  %v48_v38 = vld [vmem:[%s953_s0 + $0x10] sm:$0xff]  ;;  %v63_v39 = vld [vmem:[%s953_s0 + $0x88] sm:$0xff]  ;;  %p678_p3 = por %p677_p2, %p676_p1 }
  0x19   :  { %105 = vperm.xlu0 %669, %v37_v22   ;;  %100 = vperm.xlu1 %670, %v36_v24   ;;  %v47_v40 = vld [vmem:[%s953_s0 + $0x8] sm:$0xff]  ;;  %v62_v41 = vld [vmem:[%s953_s0 + $0x80] sm:$0xff]  ;;  %v26_v44 = vld [vmem:[%s954_s1 + $0x10] sm:$0xff] }
  0x1a   :  { %v46_v42 = vld [vmem:[%s953_s0] sm:$0xff]  ;;  %v25_v43 = vld [vmem:[%s954_s1 + $0x8] sm:$0xff]  ;;  %v27_v45 = vld [vmem:[%s954_s1 + $0x18] sm:$0xff]  ;;  %p679_p4 = pnand %p678_p3, %p672_p0 }
  0x1b   :  { %631 = vmatpush3.xpose.msk.msra.mxu0 %vm118_vm0, %v55_v21  ;;  %v28_v46 = vld [vmem:[%s954_s1 + $0x20] sm:$0xff]  ;;  %v29_v47 = vld [vmem:[%s954_s1 + $0x28] sm:$0xff]  ;;  %v30_v48 = vld [vmem:[%s954_s1 + $0x30] sm:$0xff] }
  0x1c   :  { %632 = vmatprep.subr.msk.mxu0 %vm118_vm0, %v70_v23  ;;  %v31_v49 = vld [vmem:[%s954_s1 + $0x38] sm:$0xff]  ;;  %v40_v15 = vld [vmem:[%s956_s3] sm:$0xff]  ;;  %v41_v16 = vld [vmem:[%s956_s3 + $0x8] sm:$0xff] }
  0x1d   :  { %480 = vperm.xlu0 %669, %v45_v26   ;;  %v42_v17 = vld [vmem:[%s956_s3 + $0x10] sm:$0xff]  ;;  %v43_v18 = vld [vmem:[%s956_s3 + $0x18] sm:$0xff] }
  0x1f   :  { %633 = vmatpush3.xpose.msk.msra.mxu0 %vm118_vm0, %v54_v25 }
  0x20   :  { %634 = vmatprep.subr.msk.mxu0 %vm118_vm0, %v69_v27 }
  0x23   :  { %635 = vmatpush3.xpose.msk.msra.mxu0 %vm118_vm0, %v53_v28 }
  0x24   :  { %636 = vmatprep.subr.msk.mxu0 %vm118_vm0, %v68_v29 }
  0x27   :  { %637 = vmatpush3.xpose.msk.msra.mxu0 %vm118_vm0, %v52_v30 }
  0x28   :  { %638 = vmatprep.subr.msk.mxu0 %vm118_vm0, %v67_v31 }
  0x2b   :  { %639 = vmatpush3.xpose.msk.msra.mxu0 %vm118_vm0, %v51_v32 }
  0x2c   :  { %640 = vmatprep.subr.msk.mxu0 %vm118_vm0, %v66_v33 }
  0x2f   :  { %641 = vmatpush3.xpose.msk.msra.mxu0 %vm118_vm0, %v50_v34 }
  0x30   :  { %642 = vmatprep.subr.msk.mxu0 %vm118_vm0, %v65_v35 }
  0x33   :  { %643 = vmatpush3.xpose.msk.msra.mxu0 %vm118_vm0, %v49_v36 }
  0x34   :  { %644 = vmatprep.subr.msk.mxu0 %vm118_vm0, %v64_v37 }
  0x37   :  { %645 = vmatpush3.xpose.msk.msra.mxu0 %vm118_vm0, %v48_v38 }
  0x38   :  { %646 = vmatprep.subr.msk.mxu0 %vm118_vm0, %v63_v39 }
  0x3b   :  { %647 = vmatpush3.xpose.msk.msra.mxu0 %vm118_vm0, %v47_v40 }
  0x3c   :  { %648 = vmatprep.subr.msk.mxu0 %vm118_vm0, %v62_v41 }
  0x3f   :  { %649 = vmatpush3.xpose.msk.msra.mxu0 %vm118_vm0, %v46_v42 }
  0x42   :  { %651 = vmatmul.mubr.msk.f32.vlgmr.msra.gmra.mxu0 %vm118_vm0, %v761_v8 }
  0x43   :  { %652 = vmatprep.mubr.msk.f32.mxu0 %vm118_vm0, %v25_v43 }
  0x46   :  { %653 = vmatmul.mubr.msk.f32.gmra.mxu0 %vm118_vm0, %v25_v43 }
  0x47   :  { %654 = vmatprep.mubr.msk.f32.mxu0 %vm118_vm0, %v26_v44 }
  0x4a   :  { %655 = vmatmul.mubr.msk.f32.gmra.mxu0 %vm118_vm0, %v26_v44 }
  0x4b   :  { %656 = vmatprep.mubr.msk.f32.mxu0 %vm118_vm0, %v27_v45 }
  0x4e   :  { %657 = vmatmul.mubr.msk.f32.gmra.mxu0 %vm118_vm0, %v27_v45 }
  0x4f   :  { %658 = vmatprep.mubr.msk.f32.mxu0 %vm118_vm0, %v28_v46 }
  0x52   :  { %659 = vmatmul.mubr.msk.f32.gmra.mxu0 %vm118_vm0, %v28_v46 }
  0x53   :  { %660 = vmatprep.mubr.msk.f32.mxu0 %vm118_vm0, %v29_v47 }
  0x56   :  { %661 = vmatmul.mubr.msk.f32.gmra.mxu0 %vm118_vm0, %v29_v47 }
  0x57   :  { %662 = vmatprep.mubr.msk.f32.mxu0 %vm118_vm0, %v30_v48 }
  0x5a   :  { %663 = vmatmul.mubr.msk.f32.gmra.mxu0 %vm118_vm0, %v30_v48 }
  0x5b   :  { %664 = vmatprep.mubr.msk.f32.mxu0 %vm118_vm0, %v31_v49 }
  0x5e   :  { %665 = vmatmul.mubr.msk.f32.gmra.mxu0 %vm118_vm0, %v31_v49 }
  0x7f   :  { %v86_v58 = vpop.permute.xlu1 %85 }
  0x80   :  { %v96_v55 = vpop.permute.xlu0 %95 }
  0x8c   :  { %v91_v60 = vpop.permute.xlu0 %90  ;;  %v81_v2 = vpop.permute.xlu1 %80 }
  0x90   :  { %v116_v30 = vpop.permute.xlu0 %115  ;;  %v111_v32 = vpop.permute.xlu1 %110 }
  0x94   :  { %v106_v39 = vpop.permute.xlu0 %105  ;;  %v101_v43 = vpop.permute.xlu1 %100 }
 0x102   :  { %v305_v51 = vpop.f32.mrf.mxu0 }
 0x103   :  { %v306_v9 = vadd.f32 %v305_v51, %v81_v2 }
 0x104   :  { %v307_v52 = vpop.f32.mrf.mxu0 }
 0x105   :  { %v308_v7 = vadd.f32 %v307_v52, %v81_v2  ;;  %v352_v14 = vmax.f32 %v306_v9, 0.0 }
 0x106   :  { %v311_v53 = vpop.f32.mrf.mxu0 }
 0x107   :  { %v312_v5 = vadd.f32 %v311_v53, %v86_v58  ;;  %v353_v13 = vmax.f32 %v308_v7, 0.0 }
 0x108   :  { %v313_v54 = vpop.f32.mrf.mxu0 }
 0x109   :  { %v314_v3 = vadd.f32 %v313_v54, %v86_v58  ;;  %v354_v12 = vmax.f32 %v312_v5, 0.0 }
 0x10a   :  { %v317_v56 = vpop.f32.mrf.mxu0 }
 0x10b   :  { %v318_v1 = vadd.f32 %v317_v56, %v91_v60  ;;  %v355_v11 = vmax.f32 %v314_v3, 0.0 }
 0x10c   :  { %v319_v57 = vpop.f32.mrf.mxu0 }
 0x10d   :  { %v320_v63 = vadd.f32 %v319_v57, %v91_v60  ;;  %v356_v10 = vmax.f32 %v318_v1, 0.0 }
 0x10e   :  { %v323_v59 = vpop.f32.mrf.mxu0 }
 0x10f   :  { %v324_v61 = vadd.f32 %v323_v59, %v96_v55  ;;  %v357_v8 = vmax.f32 %v320_v63, 0.0  ;;  %v44_v63 = vld [vmem:[%s957_s4] sm:$0xff] }
 0x110   :  { %v325_v62 = vpop.f32.mrf.mxu0 }
 0x111   :  { %v326_v0 = vadd.f32 %v325_v62, %v96_v55  ;;  %v358_v6 = vmax.f32 %v324_v61, 0.0 }
 0x112   :  { %v329_v19 = vpop.f32.mrf.mxu0 }
 0x113   :  { %v359_v4 = vmax.f32 %v326_v0, 0.0  ;;  %v330_v52 = vadd.f32 %v329_v19, %v101_v43  ;;  %v481_v0 = vpop.permute.xlu0 %480 }
 0x114   :  { %v331_v20 = vpop.f32.mrf.mxu0 }
 0x115   :  { %397 = vmatprep.subr.mxu1 %v359_v4  ;;  %v332_v49 = vadd.f32 %v331_v20, %v101_v43 }
 0x116   :  { %398 = vmatpush1.msra.mxu1 %v358_v6  ;;  %v335_v21 = vpop.f32.mrf.mxu0 }
 0x117   :  { %399 = vmatprep.subr.mxu1 %v357_v8  ;;  %v336_v47 = vadd.f32 %v335_v21, %v106_v39 }
 0x118   :  { %400 = vmatpush1.msra.mxu1 %v356_v10  ;;  %v337_v22 = vpop.f32.mrf.mxu0 }
 0x119   :  { %401 = vmatprep.subr.mxu1 %v355_v11  ;;  %v338_v44 = vadd.f32 %v337_v22, %v106_v39 }
 0x11a   :  { %402 = vmatpush1.msra.mxu1 %v354_v12  ;;  %v341_v23 = vpop.f32.mrf.mxu0 }
 0x11b   :  { %403 = vmatprep.subr.mxu1 %v353_v13  ;;  %v342_v40 = vadd.f32 %v341_v23, %v111_v32 }
 0x11c   :  { %404 = vmatpush1.msra.mxu1 %v352_v14  ;;  %v343_v25 = vpop.f32.mrf.mxu0 }
 0x11d   :  { %613 = vmatmul.mubr.msk.f32.vlgmr.msra.gmra.mxu1 %vm360_vm1, %v40_v15  ;;  %v344_v37 = vadd.f32 %v343_v25, %v111_v32 }
 0x11e   :  { %443 = vmatprep.mubr.f32.mxu1 %v694_v50  ;;  %v347_v28 = vpop.f32.mrf.mxu0 }
 0x11f   :  { %v348_v35 = vadd.f32 %v347_v28, %v116_v30 }
 0x120   :  { %v349_v33 = vpop.f32.mrf.mxu0 }
 0x121   :  { %614 = vmatmul.mubr.msk.f32.gmra.mxu1 %vm360_vm1, %v41_v16  ;;  %v350_v38 = vadd.f32 %v349_v33, %v116_v30 }
 0x122   :  { %449 = vmatprep.mubr.f32.mxu1 %v694_v50 }
 0x125   :  { %615 = vmatmul.mubr.msk.f32.gmra.mxu1 %vm360_vm1, %v42_v17 }
 0x126   :  { %455 = vmatprep.mubr.f32.mxu1 %v694_v50 }
 0x129   :  { %616 = vmatmul.mubr.msk.f32.gmra.mxu1 %vm360_vm1, %v43_v18 }
 0x12a   :  { %550 = vmatprep.mubr.f32.mxu1 %v694_v50 }
 0x1dd   :  { %v439_v24 = vpop.f32.mrf.mxu1 }
 0x1de   :  { %v462_v57 = vadd.f32 %v439_v24, %v330_v52 }
 0x1df   :  { %v441_v26 = vpop.f32.mrf.mxu1 }
 0x1e0   :  { %v463_v55 = vadd.f32 %v441_v26, %v332_v49  ;;  %v470_v62 = vmax.f32 %v462_v57, 0.0 }
 0x1e1   :  { %v445_v27 = vpop.f32.mrf.mxu1 }
 0x1e2   :  { %v464_v53 = vadd.f32 %v445_v27, %v336_v47  ;;  %v471_v61 = vmax.f32 %v463_v55, 0.0 }
 0x1e3   :  { %v447_v29 = vpop.f32.mrf.mxu1 }
 0x1e4   :  { %v465_v50 = vadd.f32 %v447_v29, %v338_v44  ;;  %v472_v60 = vmax.f32 %v464_v53, 0.0 }
 0x1e5   :  { %v451_v31 = vpop.f32.mrf.mxu1 }
 0x1e6   :  { %v466_v48 = vadd.f32 %v451_v31, %v342_v40  ;;  %v473_v59 = vmax.f32 %v465_v50, 0.0 }
 0x1e7   :  { %v453_v34 = vpop.f32.mrf.mxu1 }
 0x1e8   :  { %v467_v45 = vadd.f32 %v453_v34, %v344_v37  ;;  %v474_v58 = vmax.f32 %v466_v48, 0.0 }
 0x1e9   :  { %v457_v36 = vpop.f32.mrf.mxu1 }
 0x1ea   :  { %v468_v41 = vadd.f32 %v457_v36, %v348_v35  ;;  %v475_v56 = vmax.f32 %v467_v45, 0.0 }
 0x1eb   :  { %v459_v42 = vpop.f32.mrf.mxu1 }
 0x1ec   :  { %v469_v46 = vadd.f32 %v459_v42, %v350_v38  ;;  %v476_v54 = vmax.f32 %v468_v41, 0.0 }
 0x1ee   :  { %v477_v51 = vmax.f32 %v469_v46, 0.0 }
 0x1f0   :  { %510 = vmatprep.subr.mxu1 %v477_v51 }
 0x1f1   :  { %511 = vmatpush1.msra.mxu1 %v476_v54 }
 0x1f2   :  { %512 = vmatprep.subr.mxu1 %v475_v56 }
 0x1f3   :  { %513 = vmatpush1.msra.mxu1 %v474_v58 }
 0x1f4   :  { %514 = vmatprep.subr.mxu1 %v473_v59 }
 0x1f5   :  { %515 = vmatpush1.msra.mxu1 %v472_v60 }
 0x1f6   :  { %516 = vmatprep.subr.mxu1 %v471_v61 }
 0x1f7   :  { %517 = vmatpush1.msra.mxu1 %v470_v62 }
 0x1f8   :  { %617 = vmatmul.mubr.msk.f32.vlgmr.msra.gmra.mxu1 %vm360_vm1, %v44_v63 }
 0x2b8   :  { %v552_v1 = vpop.f32.mrf.mxu1 }
 0x2b9   :  { %v553_v2 = vadd.f32 %v552_v1, %v481_v0 }
 0x2ba   :  { %v554_v3 = vpop.f32.mrf.mxu1 }
 0x2bb   :  { %557 = vst [vmem:[#allocation2] sm:$0xff] %v553_v2  ;;  %v555_v4 = vadd.f32 %v554_v3, %v481_v0 }
 0x2bd   :  { %558 = vst [vmem:[#allocation2 + $0x8] sm:$0xff] %v555_v4 }
 0x2be   :  { %682 = shalt.err (!%p679_p4)
}
 0x2bf   :  { %568 = dma.vmem_to_hbm [thread:$0]  %s566_s2, 256, %s959_s6, [#allocation3]  }
 0x2c0   :  { %691 = dma.done.wait [#allocation3], 256  }
 0x2c1   :  { %692 = vsyncadd [#allocation3], 4294967040 }
 0x2c2   :  { %572 = vsyncpa [#allocation3], 1 }

</bundles_post_ra>
